<compile_context>
chip_gen: v7x
topology: tpu7x:2x2x1
jax: 0.10.0
libtpu: 0.0.40
codegen_flags: <defaults>
</compile_context>

<pallas_src>
import functools

import jax
import jax.numpy as jnp
import numpy as np
from jax.experimental import pallas as pl
from jax.experimental.pallas import tpu as pltpu

_LANE = 128
_SUBLANE = 8


def _round_up(x, m):
    return (x + m - 1) // m * m


def _moe_kernel(x_ref, w_ref, b_ref, g_ref, out_ref, y_ref, *, num_experts, cout_pad):
    # x_ref: [TM, Cin], w_ref: [Cin, E*Cout_pad], b_ref: [1, E*Cout_pad], g_ref: [TM, E]
    # One fused MXU matmul covering all experts for this row tile; fp32 accumulation.
    y = jnp.dot(x_ref[...], w_ref[...], preferred_element_type=jnp.float32)
    y = y + b_ref[...]                       # bias broadcast over rows
    y_ref[...] = y.astype(y_ref.dtype)       # lane-dense [TM, E*Cout_pad] store

    # Gated sum over experts, reading lane-aligned slices back from y_ref so the
    # compiler does not keep a second live fp32 copy of the full fused tile.
    # E is small & static -> unrolled VPU fmas; accumulator seeded with expert 0.
    g = g_ref[...].astype(jnp.float32)       # [TM, E]
    out = g[:, 0:1] * y_ref[:, 0:cout_pad]
    for e in range(1, num_experts):
        out = out + g[:, e : e + 1] * y_ref[:, e * cout_pad : (e + 1) * cout_pad]
    out_ref[...] = out.astype(out_ref.dtype)


def _tpu_generation():
    """Returns (physical VMEM bytes per TensorCore, has_two_tensorcores)."""
    try:
        kind = jax.devices()[0].device_kind.lower()
    except Exception:
        kind = ""
    is_v7 = "v7" in kind
    vmem_bytes = (64 if is_v7 else 128) * 1024 * 1024
    two_tc = is_v7 or ("v4" in kind) or ("v5p" in kind)
    return vmem_bytes, two_tc


def _pick_row_block(m_rows, cin, n_exp, cout_pad, n_pad, vmem_budget, want_two_steps):
    """Largest sublane-aligned TM whose double-buffered tiles fit the VMEM budget."""
    # Per-row bytes: 2x (x + gates + y + out) double-buffered tiles + one fp32 y temp.
    per_row = 4 * (2 * cin + 2 * n_exp + 2 * n_pad + 2 * cout_pad + n_pad)
    tm = _SUBLANE
    for cand in (8, 16, 32, 64, 128, 256, 512, 1024, 2048):
        if cand * per_row <= vmem_budget:
            tm = cand
    if want_two_steps:
        # 2 TensorCores: keep at least 2 grid steps so both get work.
        while tm > _SUBLANE and pl.cdiv(m_rows, tm) < 2:
            tm //= 2
    else:
        # Single TC: a grid of 1 is fine; just don't tile far beyond the data.
        while tm > _SUBLANE and (tm // 2) >= m_rows:
            tm //= 2
    return max(tm, _SUBLANE)


def moe_predictor_forward(x, gate_weight, expert_w, expert_b, seq_len, *,
                          y_expert_last=True, use_bf16_matmul=False):
    """
    x:            [B, L, Cin]   (float32)
    gate_weight:  [B, E]        (float32)   -- the `weight` arg of forward()
    expert_w:     [E, Cin, Cout]
    expert_b:     [E, Cout]
    returns (out [B, S, Cout], y) with S = seq_len.
      y_expert_last=True  -> y is [B, S, Cout, E]  (torch.stack(dim=-1) layout)
      y_expert_last=False -> y is [B, S, E, Cout]  (skips one full HBM pass over y)
    """
    # TODO(synk): patch=True (unsqueeze before the einsum) is shape-inconsistent with
    #             the 'bpne,be->bpn' einsum for Linear experts; only patch=False is done.
    x = x[:, -seq_len:, :]
    B, S, Cin = x.shape
    E, _, Cout = expert_w.shape

    # Lane-pad each expert's output block so stores are unmasked and per-expert
    # slices are (8,128)-aligned. Padded weight/bias lanes are zero -> padded y lanes
    # are exactly zero and never leak into returned data.
    Cout_pad = _round_up(Cout, _LANE)
    N_pad = E * Cout_pad

    w_pad = jnp.pad(expert_w, ((0, 0), (0, 0), (0, Cout_pad - Cout)))      # [E,Cin,Cp]
    w_fused = jnp.transpose(w_pad, (1, 0, 2)).reshape(Cin, N_pad)          # [Cin,E*Cp]
    b_fused = jnp.pad(expert_b, ((0, 0), (0, Cout_pad - Cout))).reshape(1, N_pad)

    # Collapse batch into the matmul M dimension; expand gates to per-row.
    M = B * S
    x_rows = x.reshape(M, Cin)
    g_rows = jnp.broadcast_to(gate_weight[:, None, :], (B, S, E)).reshape(M, E)

    if use_bf16_matmul:
        # Native-rate MXU; fp32 accumulation is kept inside the kernel.
        x_rows = x_rows.astype(jnp.bfloat16)
        w_fused = w_fused.astype(jnp.bfloat16)

    # Generation-aware tile sizing + explicit VMEM limit.
    vmem_phys, two_tc = _tpu_generation()
    vmem_cap = int(vmem_phys * 0.75)                       # headroom for internals
    const_bytes = 2 * 4 * (Cin * N_pad + N_pad)            # weights + bias (worst case 2x)
    TM = _pick_row_block(M, Cin, E, Cout_pad, N_pad,
                         max(vmem_cap - const_bytes, 1 << 20), two_tc)

    M_pad = pl.cdiv(M, TM) * TM
    if M_pad != M:
        x_rows = jnp.pad(x_rows, ((0, M_pad - M), (0, 0)))
        g_rows = jnp.pad(g_rows, ((0, M_pad - M), (0, 0)))

    kernel = functools.partial(_moe_kernel, num_experts=E, cout_pad=Cout_pad)

    def make_call(single_buffer_consts):
        const_kw = {}
        if single_buffer_consts:
            # Grid-invariant operands (constant index_map) need no second pipeline buffer.
            const_kw["pipeline_mode"] = pl.Buffered(1)
        return pl.pallas_call(
            kernel,
            out_shape=(
                jax.ShapeDtypeStruct((M_pad, Cout_pad), jnp.float32),
                jax.ShapeDtypeStruct((M_pad, N_pad), jnp.float32),
            ),
            grid_spec=pltpu.PrefetchScalarGridSpec(
                num_scalar_prefetch=0,
                grid=(M_pad // TM,),
                in_specs=[
                    pl.BlockSpec((TM, Cin), lambda i: (i, 0)),                 # x rows
                    pl.BlockSpec((Cin, N_pad), lambda i: (0, 0), **const_kw),  # fused W
                    pl.BlockSpec((1, N_pad), lambda i: (0, 0), **const_kw),    # fused b
                    pl.BlockSpec((TM, E), lambda i: (i, 0)),                   # gates
                ],
                out_specs=[
                    pl.BlockSpec((TM, Cout_pad), lambda i: (i, 0)),            # out rows
                    pl.BlockSpec((TM, N_pad), lambda i: (i, 0)),               # y rows
                ],
            ),
            compiler_params=pltpu.CompilerParams(
                dimension_semantics=("parallel",),
                vmem_limit_bytes=vmem_cap,
            ),
        )

    try:
        out_rows, y_rows = make_call(True)(x_rows, w_fused, b_fused, g_rows)
    except Exception:
        # pl.Buffered(1) single-buffering not supported by this jax/Mosaic build;
        # fall back to default double-buffered constants (correct, slightly more VMEM).
        out_rows, y_rows = make_call(False)(x_rows, w_fused, b_fused, g_rows)

    out = out_rows[:M, :Cout].reshape(B, S, Cout)
    y = y_rows[:M].reshape(B, S, E, Cout_pad)[..., :Cout]      # drop padded lanes
    if y_expert_last:
        # Match torch.stack(ys, dim=-1): [B, S, Cout, E]. This costs one extra HBM
        # pass over y; pass y_expert_last=False if the consumer accepts [B, S, E, Cout].
        y = jnp.transpose(y, (0, 1, 3, 2))
    return out, y


if __name__ == "__main__":
    # Small, deterministic synthetic setup.
    B, L, Cin, Cout, E = 2, 12, 8, 32, 3
    seq_len = 8  # pred_len is stored but unused in the PyTorch forward

    key = jax.random.PRNGKey(0)
    kx, kg, kw, kb = jax.random.split(key, 4)

    x = jax.random.normal(kx, (B, L, Cin), dtype=jnp.float32)
    gate = jax.nn.softmax(jax.random.normal(kg, (B, E), dtype=jnp.float32), axis=-1)
    expert_w = jax.random.normal(kw, (E, Cin, Cout), dtype=jnp.float32) / np.sqrt(Cin)
    expert_b = jax.random.normal(kb, (E, Cout), dtype=jnp.float32) * 0.01

    out, y = moe_predictor_forward(x, gate, expert_w, expert_b, seq_len)
    out, y = jax.block_until_ready(out), jax.block_until_ready(y)

    # Pure-JAX reference (mirrors the PyTorch forward, patch=False).
    xs = x[:, -seq_len:, :]
    y_ref = jnp.stack(
        [xs @ expert_w[e] + expert_b[e][None, None, :] for e in range(E)], axis=-1
    )
    out_ref = jnp.einsum("bpne,be->bpn", y_ref, gate)

    assert out.shape == (B, seq_len, Cout)
    assert y.shape == (B, seq_len, Cout, E)
    np.testing.assert_allclose(np.asarray(y), np.asarray(y_ref), rtol=1e-5, atol=1e-5)
    np.testing.assert_allclose(np.asarray(out), np.asarray(out_ref), rtol=1e-5, atol=1e-5)

    print("KERNEL_OK")
</pallas_src>

<mosaic_0001>
module attributes {stable_mosaic.version = 11 : i64} {
  func.func @_moe_kernel(%arg0: i32, %arg1: memref<16x8xf32, #tpu.memory_space<vmem>>, %arg2: memref<8x384xf32, #tpu.memory_space<vmem>>, %arg3: memref<1x384xf32, #tpu.memory_space<vmem>>, %arg4: memref<16x3xf32, #tpu.memory_space<vmem>>, %arg5: memref<16x128xf32, #tpu.memory_space<vmem>>, %arg6: memref<16x384xf32, #tpu.memory_space<vmem>>) attributes {dimension_semantics = [#tpu.dimension_semantics<parallel>], iteration_bounds = array<i64: 1>, scalar_prefetch = 0 : i64, scratch_operands = 0 : i64, tpu.core_type = #tpu.core_type<tc>, window_params = [{transform_indices = @transform_0, window_bounds = array<i64: 16, 8>}, {pipeline_mode = #tpu.pipeline_mode<synchronous>, transform_indices = @transform_1, window_bounds = array<i64: 8, 384>}, {pipeline_mode = #tpu.pipeline_mode<synchronous>, transform_indices = @transform_2, window_bounds = array<i64: 1, 384>}, {transform_indices = @transform_3, window_bounds = array<i64: 16, 3>}, {transform_indices = @transform_4, window_bounds = array<i64: 16, 128>}, {transform_indices = @transform_5, window_bounds = array<i64: 16, 384>}]} {
    %c0 = arith.constant 0 : index
    %c0_0 = arith.constant 0 : index
    %0 = vector.load %arg1[%c0, %c0_0] : memref<16x8xf32, #tpu.memory_space<vmem>>, vector<16x8xf32>
    %c0_1 = arith.constant 0 : index
    %c0_2 = arith.constant 0 : index
    %1 = vector.load %arg2[%c0_1, %c0_2] : memref<8x384xf32, #tpu.memory_space<vmem>>, vector<8x384xf32>
    %cst = arith.constant dense<0.000000e+00> : vector<16x384xf32>
    %2 = tpu.matmul %0, %1, %cst {dimension_numbers = #tpu.dot_dimension_numbers<[1], [0], [0], [1], [0, 0, 1, 1], [], []>} : vector<16x8xf32>, vector<8x384xf32>, vector<16x384xf32> -> vector<16x384xf32>
    %c0_3 = arith.constant 0 : index
    %c0_4 = arith.constant 0 : index
    %3 = vector.load %arg3[%c0_3, %c0_4] : memref<1x384xf32, #tpu.memory_space<vmem>>, vector<1x384xf32>
    %4 = vector.broadcast %3 : vector<1x384xf32> to vector<16x384xf32>
    %5 = arith.addf %2, %4 : vector<16x384xf32>
    %c0_5 = arith.constant 0 : index
    %c0_6 = arith.constant 0 : index
    %6 = vector.load %arg6[%c0_5, %c0_6] : memref<16x384xf32, #tpu.memory_space<vmem>>, vector<16x384xf32>
    tpu.vector_store %arg6[%c0_5, %c0_6], %5 {strides = array<i32>} : memref<16x384xf32, #tpu.memory_space<vmem>>, vector<16x384xf32>,
    %c0_7 = arith.constant 0 : index
    %c0_8 = arith.constant 0 : index
    %7 = vector.load %arg4[%c0_7, %c0_8] : memref<16x3xf32, #tpu.memory_space<vmem>>, vector<16x3xf32>
    %8 = vector.extract_strided_slice %7 {offsets = [0, 0], sizes = [16, 1], strides = [1, 1]} : vector<16x3xf32> to vector<16x1xf32>
    %c0_9 = arith.constant 0 : index
    %c0_10 = arith.constant 0 : index
    %9 = vector.load %arg6[%c0_9, %c0_10] : memref<16x384xf32, #tpu.memory_space<vmem>>, vector<16x128xf32>
    %10 = vector.broadcast %8 : vector<16x1xf32> to vector<16x128xf32>
    %11 = arith.mulf %10, %9 : vector<16x128xf32>
    %12 = vector.extract_strided_slice %7 {offsets = [0, 1], sizes = [16, 1], strides = [1, 1]} : vector<16x3xf32> to vector<16x1xf32>
    %c0_11 = arith.constant 0 : index
    %c128 = arith.constant 128 : index
    %13 = vector.load %arg6[%c0_11, %c128] : memref<16x384xf32, #tpu.memory_space<vmem>>, vector<16x128xf32>
    %14 = vector.broadcast %12 : vector<16x1xf32> to vector<16x128xf32>
    %15 = arith.mulf %14, %13 : vector<16x128xf32>
    %16 = arith.addf %11, %15 : vector<16x128xf32>
    %17 = vector.extract_strided_slice %7 {offsets = [0, 2], sizes = [16, 1], strides = [1, 1]} : vector<16x3xf32> to vector<16x1xf32>
    %c0_12 = arith.constant 0 : index
    %c256 = arith.constant 256 : index
    %18 = vector.load %arg6[%c0_12, %c256] : memref<16x384xf32, #tpu.memory_space<vmem>>, vector<16x128xf32>
    %19 = vector.broadcast %17 : vector<16x1xf32> to vector<16x128xf32>
    %20 = arith.mulf %19, %18 : vector<16x128xf32>
    %21 = arith.addf %16, %20 : vector<16x128xf32>
    %c0_13 = arith.constant 0 : index
    %c0_14 = arith.constant 0 : index
    %22 = vector.load %arg5[%c0_13, %c0_14] : memref<16x128xf32, #tpu.memory_space<vmem>>, vector<16x128xf32>
    tpu.vector_store %arg5[%c0_13, %c0_14], %21 {strides = array<i32>} : memref<16x128xf32, #tpu.memory_space<vmem>>, vector<16x128xf32>,
    return
  }
  func.func @transform_0(%arg0: i32) -> (i32, i32) {
    %c0_i32 = arith.constant 0 : i32
    %c0_i32_0 = arith.constant 0 : i32
    return %arg0, %c0_i32 : i32, i32
  }
  func.func @transform_1(%arg0: i32) -> (i32, i32) {
    %c0_i32 = arith.constant 0 : i32
    %c0_i32_0 = arith.constant 0 : i32
    %c0_i32_1 = arith.constant 0 : i32
    return %c0_i32, %c0_i32_0 : i32, i32
  }
  func.func @transform_2(%arg0: i32) -> (i32, i32) {
    %c0_i32 = arith.constant 0 : i32
    %c0_i32_0 = arith.constant 0 : i32
    %c0_i32_1 = arith.constant 0 : i32
    return %c0_i32, %c0_i32_0 : i32, i32
  }
  func.func @transform_3(%arg0: i32) -> (i32, i32) {
    %c0_i32 = arith.constant 0 : i32
    %c0_i32_0 = arith.constant 0 : i32
    return %arg0, %c0_i32 : i32, i32
  }
  func.func @transform_4(%arg0: i32) -> (i32, i32) {
    %c0_i32 = arith.constant 0 : i32
    %c0_i32_0 = arith.constant 0 : i32
    return %arg0, %c0_i32 : i32, i32
  }
  func.func @transform_5(%arg0: i32) -> (i32, i32) {
    %c0_i32 = arith.constant 0 : i32
    %c0_i32_0 = arith.constant 0 : i32
    return %arg0, %c0_i32 : i32, i32
  }
}

module attributes {stable_mosaic.version = 11 : i64} {
  func.func @_moe_kernel(%arg0: i32, %arg1: memref<16x8xf32, #tpu.memory_space<vmem>>, %arg2: memref<8x384xf32, #tpu.memory_space<vmem>>, %arg3: memref<1x384xf32, #tpu.memory_space<vmem>>, %arg4: memref<16x3xf32, #tpu.memory_space<vmem>>, %arg5: memref<16x128xf32, #tpu.memory_space<vmem>>, %arg6: memref<16x384xf32, #tpu.memory_space<vmem>>) attributes {dimension_semantics = [#tpu.dimension_semantics<parallel>], iteration_bounds = array<i64: 1>, scalar_prefetch = 0 : i64, scratch_operands = 0 : i64, tpu.core_type = #tpu.core_type<tc>, window_params = [{transform_indices = @transform_0, window_bounds = array<i64: 16, 8>}, {pipeline_mode = #tpu.pipeline_mode<synchronous>, transform_indices = @transform_1, window_bounds = array<i64: 8, 384>}, {pipeline_mode = #tpu.pipeline_mode<synchronous>, transform_indices = @transform_2, window_bounds = array<i64: 1, 384>}, {transform_indices = @transform_3, window_bounds = array<i64: 16, 3>}, {transform_indices = @transform_4, window_bounds = array<i64: 16, 128>}, {transform_indices = @transform_5, window_bounds = array<i64: 16, 384>}]} {
    %c0 = arith.constant 0 : index
    %c0_0 = arith.constant 0 : index
    %0 = vector.load %arg1[%c0, %c0_0] : memref<16x8xf32, #tpu.memory_space<vmem>>, vector<16x8xf32>
    %c0_1 = arith.constant 0 : index
    %c0_2 = arith.constant 0 : index
    %1 = vector.load %arg2[%c0_1, %c0_2] : memref<8x384xf32, #tpu.memory_space<vmem>>, vector<8x384xf32>
    %cst = arith.constant dense<0.000000e+00> : vector<16x384xf32>
    %2 = tpu.matmul %0, %1, %cst {dimension_numbers = #tpu.dot_dimension_numbers<[1], [0], [0], [1], [0, 0, 1, 1], [], []>} : vector<16x8xf32>, vector<8x384xf32>, vector<16x384xf32> -> vector<16x384xf32>
    %c0_3 = arith.constant 0 : index
    %c0_4 = arith.constant 0 : index
    %3 = vector.load %arg3[%c0_3, %c0_4] : memref<1x384xf32, #tpu.memory_space<vmem>>, vector<1x384xf32>
    %4 = vector.broadcast %3 : vector<1x384xf32> to vector<16x384xf32>
    %5 = arith.addf %2, %4 : vector<16x384xf32>
    %c0_5 = arith.constant 0 : index
    %c0_6 = arith.constant 0 : index
    %6 = vector.load %arg6[%c0_5, %c0_6] : memref<16x384xf32, #tpu.memory_space<vmem>>, vector<16x384xf32>
    tpu.vector_store %arg6[%c0_5, %c0_6], %5 {strides = array<i32>} : memref<16x384xf32, #tpu.memory_space<vmem>>, vector<16x384xf32>,
    %c0_7 = arith.constant 0 : index
    %c0_8 = arith.constant 0 : index
    %7 = vector.load %arg4[%c0_7, %c0_8] : memref<16x3xf32, #tpu.memory_space<vmem>>, vector<16x3xf32>
    %8 = vector.extract_strided_slice %7 {offsets = [0, 0], sizes = [16, 1], strides = [1, 1]} : vector<16x3xf32> to vector<16x1xf32>
    %c0_9 = arith.constant 0 : index
    %c0_10 = arith.constant 0 : index
    %9 = vector.load %arg6[%c0_9, %c0_10] : memref<16x384xf32, #tpu.memory_space<vmem>>, vector<16x128xf32>
    %10 = vector.broadcast %8 : vector<16x1xf32> to vector<16x128xf32>
    %11 = arith.mulf %10, %9 : vector<16x128xf32>
    %12 = vector.extract_strided_slice %7 {offsets = [0, 1], sizes = [16, 1], strides = [1, 1]} : vector<16x3xf32> to vector<16x1xf32>
    %c0_11 = arith.constant 0 : index
    %c128 = arith.constant 128 : index
    %13 = vector.load %arg6[%c0_11, %c128] : memref<16x384xf32, #tpu.memory_space<vmem>>, vector<16x128xf32>
    %14 = vector.broadcast %12 : vector<16x1xf32> to vector<16x128xf32>
    %15 = arith.mulf %14, %13 : vector<16x128xf32>
    %16 = arith.addf %11, %15 : vector<16x128xf32>
    %17 = vector.extract_strided_slice %7 {offsets = [0, 2], sizes = [16, 1], strides = [1, 1]} : vector<16x3xf32> to vector<16x1xf32>
    %c0_12 = arith.constant 0 : index
    %c256 = arith.constant 256 : index
    %18 = vector.load %arg6[%c0_12, %c256] : memref<16x384xf32, #tpu.memory_space<vmem>>, vector<16x128xf32>
    %19 = vector.broadcast %17 : vector<16x1xf32> to vector<16x128xf32>
    %20 = arith.mulf %19, %18 : vector<16x128xf32>
    %21 = arith.addf %16, %20 : vector<16x128xf32>
    %c0_13 = arith.constant 0 : index
    %c0_14 = arith.constant 0 : index
    %22 = vector.load %arg5[%c0_13, %c0_14] : memref<16x128xf32, #tpu.memory_space<vmem>>, vector<16x128xf32>
    tpu.vector_store %arg5[%c0_13, %c0_14], %21 {strides = array<i32>} : memref<16x128xf32, #tpu.memory_space<vmem>>, vector<16x128xf32>,
    return
  }
  func.func @transform_0(%arg0: i32) -> (i32, i32) {
    %c0_i32 = arith.constant 0 : i32
    %c0_i32_0 = arith.constant 0 : i32
    return %arg0, %c0_i32 : i32, i32
  }
  func.func @transform_1(%arg0: i32) -> (i32, i32) {
    %c0_i32 = arith.constant 0 : i32
    %c0_i32_0 = arith.constant 0 : i32
    %c0_i32_1 = arith.constant 0 : i32
    return %c0_i32, %c0_i32_0 : i32, i32
  }
  func.func @transform_2(%arg0: i32) -> (i32, i32) {
    %c0_i32 = arith.constant 0 : i32
    %c0_i32_0 = arith.constant 0 : i32
    %c0_i32_1 = arith.constant 0 : i32
    return %c0_i32, %c0_i32_0 : i32, i32
  }
  func.func @transform_3(%arg0: i32) -> (i32, i32) {
    %c0_i32 = arith.constant 0 : i32
    %c0_i32_0 = arith.constant 0 : i32
    return %arg0, %c0_i32 : i32, i32
  }
  func.func @transform_4(%arg0: i32) -> (i32, i32) {
    %c0_i32 = arith.constant 0 : i32
    %c0_i32_0 = arith.constant 0 : i32
    return %arg0, %c0_i32 : i32, i32
  }
  func.func @transform_5(%arg0: i32) -> (i32, i32) {
    %c0_i32 = arith.constant 0 : i32
    %c0_i32_0 = arith.constant 0 : i32
    return %arg0, %c0_i32 : i32, i32
  }
}

</mosaic_0001>

<bundles_post_ra>
// kernel: tpu_custom_call.1
= control target key start
LH: loop header
LB: loop body
LE: loop exit
PB: predicated region body
PF: predicated region fallthrough
CT: control target
= control target key end

     0   :  { %11 = vsyncpa [#allocation3], 0  ;;  %s655_s0 = inlined_call_operand.hbm [shape: f32[16,8], index: 0, kind: input, shape index: {}]   ;;  %s656_s1 = inlined_call_operand.hbm [shape: f32[8,384], index: 1, kind: input, shape index: {}]   ;;  %s657_s2 = inlined_call_operand.hbm [shape: f32[1,384], index: 2, kind: input, shape index: {}]   ;;  %s658_s3 = inlined_call_operand.hbm [shape: f32[16,3], index: 3, kind: input, shape index: {}]   ;;  %s659_s4 = inlined_call_operand.hbm [shape: f32[16,128], index: 4, kind: output, shape index: {0}]   ;;  %s660_s5 = inlined_call_operand.hbm [shape: f32[16,384], index: 5, kind: output, shape index: {1}]  }
   0x1   :  { %12 = vsyncpa [#allocation6], 0 }
   0x2   :  { %13 = vsyncpa [#allocation9], 0 }
   0x3   :  { %14 = vsyncpa [#allocation4], 0 }
   0x4   :  { %15 = vsyncpa [#allocation12], 0  ;;  %s512_s18 = smov [#allocation5]   ;;  %s513_s20 = smov [#allocation2]  }
   0x5   :  { %s34_s19 = sshll.u32 %s512_s18, 4  ;;  %s21_s21 = sshll.u32 %s513_s20, 4  ;;  %s35_s19 = int_to_ptr.vmem [resolvable:$true] %s34_s19  ;;  %s556_s21 = int_to_ptr.vmem [resolvable:$true] %s21_s21 }
   0x6   :  { %s370_s24 = scalar_lea.hbm %s656_s1, 384 }
   0x7   :  { %p371_p0 = scmp.ne.s32.totalorder %s656_s1, %s370_s24  ;;  %p374_p1 = scmp.lt.u32.totalorder %s370_s24, %s656_s1 }
   0x9   :  { %p376_p2 = pnand %p374_p1, %p371_p0 }
   0xb   :  { %379 = shalt.err (!%p376_p2)
}
   0xc   :  { %s380_s29 = scalar_lea.vmem %s35_s19, 384  ;;  %p385_p4 = scmp.lt.s32.totalorder %s35_s19, %s35_s19 }
   0xd   :  { %p381_p3 = scmp.ne.s32.totalorder %s35_s19, %s380_s29  ;;  %p386_p5 = scmp.lt.s32.totalorder %s380_s29, %s380_s29 }
   0xf   :  { %p387_p6 = por %p386_p5, %p385_p4 }
  0x11   :  { %p388_p7 = pnand %p387_p6, %p381_p3 }
  0x13   :  { %391 = shalt.err (!%p388_p7)
}
  0x14   :  { %37 = dma.hbm_to_vmem [thread:$0]  %s656_s1, 384, %s35_s19, [#allocation6]  }
  0x15   :  { %s392_s9 = scalar_lea.hbm %s655_s0, 256 }
  0x16   :  { %p393_p8 = scmp.ne.s32.totalorder %s655_s0, %s392_s9  ;;  %p396_p9 = scmp.lt.u32.totalorder %s392_s9, %s655_s0 }
  0x18   :  { %p398_p10 = pnand %p396_p9, %p393_p8 }
  0x1a   :  { %401 = shalt.err (!%p398_p10)
}
  0x1b   :  { %s402_s14 = scalar_lea.vmem %s556_s21, 256  ;;  %p407_p12 = scmp.lt.s32.totalorder %s556_s21, %s556_s21 }
  0x1c   :  { %p403_p11 = scmp.ne.s32.totalorder %s556_s21, %s402_s14  ;;  %p408_p13 = scmp.lt.s32.totalorder %s402_s14, %s402_s14 }
  0x1e   :  { %p409_p0 = por %p408_p13, %p407_p12 }
  0x20   :  { %p410_p1 = pnand %p409_p0, %p403_p11 }
  0x22   :  { %413 = shalt.err (!%p410_p1)
}
  0x23   :  { %s514_s1 = smov 128   ;;  %s515_s15 = smov 8  }
  0x24   :  { %27 = dma.hbm_to_vmem [thread:$0]  %s655_s0, 256, %s556_s21, [#allocation3], %s514_s1, %s514_s1, %s515_s15  }
  0x25   :  { %s516_s18 = smov [#allocation7]   ;;  %s517_s20 = smov [#allocation8]  }
  0x26   :  { %s44_s19 = sshll.u32 %s516_s18, 4  ;;  %s53_s22 = sshll.u32 %s517_s20, 4  ;;  %s45_s19 = int_to_ptr.vmem [resolvable:$true] %s44_s19  ;;  %s590_s22 = int_to_ptr.vmem [resolvable:$true] %s53_s22 }
  0x27   :  { %s414_s25 = scalar_lea.hbm %s657_s2, 48 }
  0x28   :  { %p415_p2 = scmp.ne.s32.totalorder %s657_s2, %s414_s25  ;;  %p418_p3 = scmp.lt.u32.totalorder %s414_s25, %s657_s2 }
  0x2a   :  { %p420_p4 = pnand %p418_p3, %p415_p2 }
  0x2c   :  { %423 = shalt.err (!%p420_p4)
}
  0x2d   :  { %s424_s0 = scalar_lea.vmem %s45_s19, 48  ;;  %s428_s21 = scalar_lea.vmem %s45_s19, 64 }
  0x2e   :  { %p425_p5 = scmp.ne.s32.totalorder %s45_s19, %s424_s0  ;;  %p429_p6 = scmp.lt.s32.totalorder %s45_s19, %s45_s19 }
  0x2f   :  { %p430_p7 = scmp.lt.s32.totalorder %s428_s21, %s424_s0 }
  0x31   :  { %p431_p8 = por %p430_p7, %p429_p6 }
  0x33   :  { %p432_p9 = pnand %p431_p8, %p425_p5 }
  0x35   :  { %435 = shalt.err (!%p432_p9)
}
  0x36   :  { %47 = dma.hbm_to_vmem [thread:$0]  %s657_s2, 48, %s45_s19, [#allocation6]  }
  0x37   :  { %s436_s9 = scalar_lea.hbm %s658_s3, 256 }
  0x38   :  { %p437_p10 = scmp.ne.s32.totalorder %s658_s3, %s436_s9  ;;  %p440_p11 = scmp.lt.u32.totalorder %s436_s9, %s658_s3 }
  0x3a   :  { %p442_p12 = pnand %p440_p11, %p437_p10 }
  0x3c   :  { %445 = shalt.err (!%p442_p12)
}
  0x3d   :  { %s446_s14 = scalar_lea.vmem %s590_s22, 256  ;;  %p451_p0 = scmp.lt.s32.totalorder %s590_s22, %s590_s22 }
  0x3e   :  { %p447_p13 = scmp.ne.s32.totalorder %s590_s22, %s446_s14  ;;  %p452_p1 = scmp.lt.s32.totalorder %s446_s14, %s446_s14 }
  0x40   :  { %p453_p2 = por %p452_p1, %p451_p0 }
  0x42   :  { %p454_p3 = pnand %p453_p2, %p447_p13 }
  0x44   :  { %457 = shalt.err (!%p454_p3)
}
  0x45   :  { %59 = dma.hbm_to_vmem [thread:$0]  %s658_s3, 256, %s590_s22, [#allocation9], %s514_s1, %s514_s1, %s515_s15  }
  0x46   :  { %502 = dma.done.wait [#allocation3], 256  }
  0x47   :  { %503 = vsyncadd [#allocation3], 4294967040 }
  0x48   :  { %504 = dma.done.wait [#allocation6], 432  }
  0x49   :  { %505 = vsyncadd [#allocation6], 4294966864 }
  0x4a   :  { %506 = dma.done.wait [#allocation9], 256  }
  0x4b   :  { %507 = vsyncadd [#allocation9], 4294967040  ;;  %v518_v0 = vmov 0.0   ;;  %v519_v1 = vmov 1   ;;  %v520_v2 = vmov 0   ;;  %vm94_vm0 = vcmask 64512  }
  0x4c   :  { %165 = vmatprep.mubr.f32.mxu0 %v518_v0  ;;  %367 = vset.pattern.permute.xlu1 %v519_v1  ;;  %v75_v3 = vld [vmem:[#allocation5 + $0x8] sm:$0xff]  ;;  %v74_v4 = vld [vmem:[#allocation5] sm:$0xff]  ;;  %v72_v5 = vld [vmem:[#allocation2] sm:$0xff]  ;;  %v521_v10 = vmov 2   ;;  %v79_v11 = vlaneseq  ;;  %s522_s3 = smov [#allocation11]   ;;  %s523_s18 = smov [#allocation10]  }
  0x4d   :  { %366 = vset.pattern.permute.xlu0 %v520_v2  ;;  %101 = vmatprep.subr.mxu0 %v75_v3  ;;  %v76_v6 = vld [vmem:[#allocation5 + $0x10] sm:$0xff]  ;;  %v73_v7 = vld [vmem:[#allocation2 + $0x8] sm:$0xff]  ;;  %v260_v9 = vld [vmem:[#allocation8 + $0x8] sm:$0xff]  ;;  %s322_s17 = sshll.u32 %s522_s3, 4  ;;  %s310_s19 = sshll.u32 %s523_s18, 4  ;;  %s323_s17 = int_to_ptr.vmem [resolvable:$true] %s322_s17  ;;  %s311_s19 = int_to_ptr.vmem [resolvable:$true] %s310_s19 }
  0x4e   :  { %349 = vmatprep.mubr.msk.f32.mxu1 %vm94_vm0, %v72_v5  ;;  %102 = vmatpush1.msra.mxu0 %v74_v4  ;;  %v259_v8 = vld [vmem:[#allocation8] sm:$0xff]  ;;  %v80_v12 = vshrl.u32 %v79_v11, 7  ;;  %v77_v15 = vld [vmem:[#allocation7] sm:$0x7]  ;;  %s458_s20 = scalar_lea.vmem %s323_s17, 768  ;;  %p463_p5 = scmp.lt.s32.totalorder %s323_s17, %s323_s17 }
  0x4f   :  { %347 = vmatprep.subr.mxu1 %v76_v6  ;;  %340 = vmatmul.mubr.msk.f32.vlgmr.msra.gmra.mrb[0].mxu0 %vm94_vm0, %v72_v5  ;;  %p459_p4 = scmp.ne.s32.totalorder %s323_s17, %s458_s20  ;;  %p464_p6 = scmp.lt.s32.totalorder %s458_s20, %s458_s20 }
  0x50   :  { %348 = vmatpush3.msra.mxu1 %v76_v6  ;;  %171 = vmatprep.mubr.f32.mxu0 %v518_v0  ;;  %v81_v14 = vsub.s32 0, %v80_v12  ;;  %v85_v16 = vsub.s32 1, %v80_v12  ;;  %v89_v18 = vsub.s32 2, %v80_v12 }
  0x51   :  { %350 = vmatmul.mubr.msk.f32.vlgmr.msra.gmra.mrb[0].mxu1 %vm94_vm0, %v73_v7  ;;  %278 = vperm.xlu1 %367, %v259_v8   ;;  %p465_p7 = por %p464_p6, %p463_p5 }
  0x52   :  { %265 = vperm.xlu0 %366, %v259_v8   ;;  %v82_v20 = vrot.slane %v77_v15, %v81_v14  ;;  %v86_v21 = vrot.slane %v77_v15, %v85_v16  ;;  %v90_v22 = vrot.slane %v77_v15, %v89_v18 }
  0x53   :  { %341 = vmatmul.mubr.msk.f32.gmra.mrb[2].mxu0 %vm94_vm0, %v73_v7  ;;  %p466_p8 = pnand %p465_p7, %p459_p4 }
  0x55   :  { %282 = vperm.xlu1 %367, %v260_v9  }
  0x56   :  { %270 = vperm.xlu0 %366, %v260_v9  }
  0x59   :  { %369 = vset.pattern.permute.xlu1 %v521_v10 }
  0x5a   :  { %368 = vset.pattern.permute.xlu0 %v521_v10  ;;  %296 = vperm.xlu1 %369, %v260_v9  }
  0x5b   :  { %292 = vperm.xlu0 %368, %v259_v8  }
  0xd0   :  { %v279_v17 = vpop.permute.xlu1 %278 }
  0xd1   :  { %v266_v13 = vpop.permute.xlu0 %265 }
  0xd4   :  { %v283_v24 = vpop.permute.xlu1 %282 }
  0xd5   :  { %v271_v19 = vpop.permute.xlu0 %270 }
  0xd9   :  { %v297_v39 = vpop.permute.xlu1 %296 }
  0xda   :  { %v293_v31 = vpop.permute.xlu0 %292 }
 0x122   :  { %v167_v23 = vpop.f32.mrb[0].mxu0 }
 0x123   :  { %v168_v25 = vadd.f32 %v167_v23, %v82_v20  ;;  %v169_v26 = vpop.f32.mrb[1].mxu0 }
 0x124   :  { %v351_v27 = vpop.f32.mrb[0].mxu1  ;;  %v170_v28 = vadd.f32 %v169_v26, %v86_v21 }
 0x125   :  { %v250_v29 = vadd.f32 %v351_v27, %v90_v22  ;;  %v244_v30 = vpop.f32.mrb[1].mxu1  ;;  %253 = vst [vmem:[#allocation11] sm:$0xff] %v168_v25  ;;  %v273_v33 = vmul.f32 %v266_v13, %v168_v25 }
 0x126   :  { %v245_v32 = vadd.f32 %v244_v30, %v90_v22  ;;  %254 = vst [vmem:[#allocation11 + $0x8] sm:$0xff] %v170_v28  ;;  %v285_v34 = vmul.f32 %v279_v17, %v170_v28  ;;  %v173_v35 = vpop.f32.mrb[2].mxu0 }
 0x127   :  { %258 = vst [vmem:[#allocation11 + $0x28] sm:$0xff] %v250_v29  ;;  %v174_v36 = vadd.f32 %v173_v35, %v82_v20  ;;  %v175_v37 = vpop.f32.mrb[3].mxu0  ;;  %v300_v45 = vmul.f32 %v297_v39, %v250_v29 }
 0x128   :  { %255 = vst [vmem:[#allocation11 + $0x10] sm:$0xff] %v245_v32  ;;  %v299_v38 = vmul.f32 %v293_v31, %v245_v32  ;;  %v287_v40 = vadd.f32 %v285_v34, %v273_v33  ;;  %v176_v41 = vadd.f32 %v175_v37, %v86_v21 }
 0x129   :  { %256 = vst [vmem:[#allocation11 + $0x18] sm:$0xff] %v174_v36  ;;  %v274_v42 = vmul.f32 %v271_v19, %v174_v36 }
 0x12a   :  { %257 = vst [vmem:[#allocation11 + $0x20] sm:$0xff] %v176_v41  ;;  %v286_v43 = vmul.f32 %v283_v24, %v176_v41  ;;  %v301_v44 = vadd.f32 %v299_v38, %v287_v40 }
 0x12b   :  { %469 = shalt.err (!%p466_p8)
}
 0x12c   :  { %s470_s24 = scalar_lea.hbm %s660_s5, 768 }
 0x12d   :  { %p471_p9 = scmp.ne.s32.totalorder %s660_s5, %s470_s24  ;;  %p474_p10 = scmp.lt.u32.totalorder %s470_s24, %s660_s5 }
 0x12f   :  { %p476_p11 = pnand %p474_p10, %p471_p9 }
 0x131   :  { %479 = shalt.err (!%p476_p11)
}
 0x132   :  { %s524_s29 = smov 384   ;;  %s525_s0 = smov 24   ;;  %v288_v46 = vadd.f32 %v286_v43, %v274_v42  ;;  %303 = vst [vmem:[#allocation10] sm:$0xff] %v301_v44 }
 0x133   :  { %328 = dma.vmem_to_hbm [thread:$0]  %s323_s17, 768, %s660_s5, [#allocation12], %s524_s29, %s524_s29, %s525_s0  }
 0x134   :  { %v302_v47 = vadd.f32 %v300_v45, %v288_v46  ;;  %s480_s6 = scalar_lea.vmem %s311_s19, 256  ;;  %p485_p13 = scmp.lt.s32.totalorder %s311_s19, %s311_s19 }
 0x135   :  { %p481_p12 = scmp.ne.s32.totalorder %s311_s19, %s480_s6  ;;  %p486_p0 = scmp.lt.s32.totalorder %s480_s6, %s480_s6 }
 0x136   :  { %304 = vst [vmem:[#allocation10 + $0x8] sm:$0xff] %v302_v47 }
 0x137   :  { %p487_p1 = por %p486_p0, %p485_p13 }
 0x139   :  { %p488_p2 = pnand %p487_p1, %p481_p12 }
 0x13b   :  { %491 = shalt.err (!%p488_p2)
}
 0x13c   :  { %s492_s9 = scalar_lea.hbm %s659_s4, 256 }
 0x13d   :  { %p493_p3 = scmp.ne.s32.totalorder %s659_s4, %s492_s9  ;;  %p496_p4 = scmp.lt.u32.totalorder %s492_s9, %s659_s4 }
 0x13f   :  { %p498_p5 = pnand %p496_p4, %p493_p3 }
 0x141   :  { %501 = shalt.err (!%p498_p5)
}
 0x142   :  { %316 = dma.vmem_to_hbm [thread:$0]  %s311_s19, 256, %s659_s4, [#allocation4], %s514_s1, %s514_s1, %s515_s15  }
 0x143   :  { %508 = dma.done.wait [#allocation4], 256  }
 0x144   :  { %509 = vsyncadd [#allocation4], 4294967040 }
 0x145   :  { %510 = dma.done.wait [#allocation12], 768  }
 0x146   :  { %511 = vsyncadd [#allocation12], 4294966528 }
 0x147   :  { %335 = vsyncpa [#allocation3], 1 }
 0x148   :  { %336 = vsyncpa [#allocation6], 1 }
 0x149   :  { %337 = vsyncpa [#allocation9], 1 }
 0x14a   :  { %338 = vsyncpa [#allocation4], 1 }
 0x14b   :  { %339 = vsyncpa [#allocation12], 1 }

// kernel: tpu_custom_call.1
= control target key start
LH: loop header
LB: loop body
LE: loop exit
PB: predicated region body
PF: predicated region fallthrough
CT: control target
= control target key end

     0   :  { %11 = vsyncpa [#allocation3], 0  ;;  %s655_s0 = inlined_call_operand.hbm [shape: f32[16,8], index: 0, kind: input, shape index: {}]   ;;  %s656_s1 = inlined_call_operand.hbm [shape: f32[8,384], index: 1, kind: input, shape index: {}]   ;;  %s657_s2 = inlined_call_operand.hbm [shape: f32[1,384], index: 2, kind: input, shape index: {}]   ;;  %s658_s3 = inlined_call_operand.hbm [shape: f32[16,3], index: 3, kind: input, shape index: {}]   ;;  %s659_s4 = inlined_call_operand.hbm [shape: f32[16,128], index: 4, kind: output, shape index: {0}]   ;;  %s660_s5 = inlined_call_operand.hbm [shape: f32[16,384], index: 5, kind: output, shape index: {1}]  }
   0x1   :  { %12 = vsyncpa [#allocation6], 0 }
   0x2   :  { %13 = vsyncpa [#allocation9], 0 }
   0x3   :  { %14 = vsyncpa [#allocation4], 0 }
   0x4   :  { %15 = vsyncpa [#allocation12], 0  ;;  %s512_s18 = smov [#allocation5]   ;;  %s513_s20 = smov [#allocation2]  }
   0x5   :  { %s34_s19 = sshll.u32 %s512_s18, 4  ;;  %s21_s21 = sshll.u32 %s513_s20, 4  ;;  %s35_s19 = int_to_ptr.vmem [resolvable:$true] %s34_s19  ;;  %s556_s21 = int_to_ptr.vmem [resolvable:$true] %s21_s21 }
   0x6   :  { %s370_s24 = scalar_lea.hbm %s656_s1, 384 }
   0x7   :  { %p371_p0 = scmp.ne.s32.totalorder %s656_s1, %s370_s24  ;;  %p374_p1 = scmp.lt.u32.totalorder %s370_s24, %s656_s1 }
   0x9   :  { %p376_p2 = pnand %p374_p1, %p371_p0 }
   0xb   :  { %379 = shalt.err (!%p376_p2)
}
   0xc   :  { %s380_s29 = scalar_lea.vmem %s35_s19, 384  ;;  %p385_p4 = scmp.lt.s32.totalorder %s35_s19, %s35_s19 }
   0xd   :  { %p381_p3 = scmp.ne.s32.totalorder %s35_s19, %s380_s29  ;;  %p386_p5 = scmp.lt.s32.totalorder %s380_s29, %s380_s29 }
   0xf   :  { %p387_p6 = por %p386_p5, %p385_p4 }
  0x11   :  { %p388_p7 = pnand %p387_p6, %p381_p3 }
  0x13   :  { %391 = shalt.err (!%p388_p7)
}
  0x14   :  { %37 = dma.hbm_to_vmem [thread:$0]  %s656_s1, 384, %s35_s19, [#allocation6]  }
  0x15   :  { %s392_s9 = scalar_lea.hbm %s655_s0, 256 }
  0x16   :  { %p393_p8 = scmp.ne.s32.totalorder %s655_s0, %s392_s9  ;;  %p396_p9 = scmp.lt.u32.totalorder %s392_s9, %s655_s0 }
  0x18   :  { %p398_p10 = pnand %p396_p9, %p393_p8 }
  0x1a   :  { %401 = shalt.err (!%p398_p10)
}
  0x1b   :  { %s402_s14 = scalar_lea.vmem %s556_s21, 256  ;;  %p407_p12 = scmp.lt.s32.totalorder %s556_s21, %s556_s21 }
  0x1c   :  { %p403_p11 = scmp.ne.s32.totalorder %s556_s21, %s402_s14  ;;  %p408_p13 = scmp.lt.s32.totalorder %s402_s14, %s402_s14 }
  0x1e   :  { %p409_p0 = por %p408_p13, %p407_p12 }
  0x20   :  { %p410_p1 = pnand %p409_p0, %p403_p11 }
  0x22   :  { %413 = shalt.err (!%p410_p1)
}
  0x23   :  { %s514_s1 = smov 128   ;;  %s515_s15 = smov 8  }
  0x24   :  { %27 = dma.hbm_to_vmem [thread:$0]  %s655_s0, 256, %s556_s21, [#allocation3], %s514_s1, %s514_s1, %s515_s15  }
  0x25   :  { %s516_s18 = smov [#allocation7]   ;;  %s517_s20 = smov [#allocation8]  }
  0x26   :  { %s44_s19 = sshll.u32 %s516_s18, 4  ;;  %s53_s22 = sshll.u32 %s517_s20, 4  ;;  %s45_s19 = int_to_ptr.vmem [resolvable:$true] %s44_s19  ;;  %s590_s22 = int_to_ptr.vmem [resolvable:$true] %s53_s22 }
  0x27   :  { %s414_s25 = scalar_lea.hbm %s657_s2, 48 }
  0x28   :  { %p415_p2 = scmp.ne.s32.totalorder %s657_s2, %s414_s25  ;;  %p418_p3 = scmp.lt.u32.totalorder %s414_s25, %s657_s2 }
  0x2a   :  { %p420_p4 = pnand %p418_p3, %p415_p2 }
  0x2c   :  { %423 = shalt.err (!%p420_p4)
}
  0x2d   :  { %s424_s0 = scalar_lea.vmem %s45_s19, 48  ;;  %s428_s21 = scalar_lea.vmem %s45_s19, 64 }
  0x2e   :  { %p425_p5 = scmp.ne.s32.totalorder %s45_s19, %s424_s0  ;;  %p429_p6 = scmp.lt.s32.totalorder %s45_s19, %s45_s19 }
  0x2f   :  { %p430_p7 = scmp.lt.s32.totalorder %s428_s21, %s424_s0 }
  0x31   :  { %p431_p8 = por %p430_p7, %p429_p6 }
  0x33   :  { %p432_p9 = pnand %p431_p8, %p425_p5 }
  0x35   :  { %435 = shalt.err (!%p432_p9)
}
  0x36   :  { %47 = dma.hbm_to_vmem [thread:$0]  %s657_s2, 48, %s45_s19, [#allocation6]  }
  0x37   :  { %s436_s9 = scalar_lea.hbm %s658_s3, 256 }
  0x38   :  { %p437_p10 = scmp.ne.s32.totalorder %s658_s3, %s436_s9  ;;  %p440_p11 = scmp.lt.u32.totalorder %s436_s9, %s658_s3 }
  0x3a   :  { %p442_p12 = pnand %p440_p11, %p437_p10 }
  0x3c   :  { %445 = shalt.err (!%p442_p12)
}
  0x3d   :  { %s446_s14 = scalar_lea.vmem %s590_s22, 256  ;;  %p451_p0 = scmp.lt.s32.totalorder %s590_s22, %s590_s22 }
  0x3e   :  { %p447_p13 = scmp.ne.s32.totalorder %s590_s22, %s446_s14  ;;  %p452_p1 = scmp.lt.s32.totalorder %s446_s14, %s446_s14 }
  0x40   :  { %p453_p2 = por %p452_p1, %p451_p0 }
  0x42   :  { %p454_p3 = pnand %p453_p2, %p447_p13 }
  0x44   :  { %457 = shalt.err (!%p454_p3)
}
  0x45   :  { %59 = dma.hbm_to_vmem [thread:$0]  %s658_s3, 256, %s590_s22, [#allocation9], %s514_s1, %s514_s1, %s515_s15  }
  0x46   :  { %502 = dma.done.wait [#allocation3], 256  }
  0x47   :  { %503 = vsyncadd [#allocation3], 4294967040 }
  0x48   :  { %504 = dma.done.wait [#allocation6], 432  }
  0x49   :  { %505 = vsyncadd [#allocation6], 4294966864 }
  0x4a   :  { %506 = dma.done.wait [#allocation9], 256  }
  0x4b   :  { %507 = vsyncadd [#allocation9], 4294967040  ;;  %v518_v0 = vmov 0.0   ;;  %v519_v1 = vmov 1   ;;  %v520_v2 = vmov 0   ;;  %vm94_vm0 = vcmask 64512  }
  0x4c   :  { %165 = vmatprep.mubr.f32.mxu0 %v518_v0  ;;  %367 = vset.pattern.permute.xlu1 %v519_v1  ;;  %v75_v3 = vld [vmem:[#allocation5 + $0x8] sm:$0xff]  ;;  %v74_v4 = vld [vmem:[#allocation5] sm:$0xff]  ;;  %v72_v5 = vld [vmem:[#allocation2] sm:$0xff]  ;;  %v521_v10 = vmov 2   ;;  %v79_v11 = vlaneseq  ;;  %s522_s3 = smov [#allocation11]   ;;  %s523_s18 = smov [#allocation10]  }
  0x4d   :  { %366 = vset.pattern.permute.xlu0 %v520_v2  ;;  %101 = vmatprep.subr.mxu0 %v75_v3  ;;  %v76_v6 = vld [vmem:[#allocation5 + $0x10] sm:$0xff]  ;;  %v73_v7 = vld [vmem:[#allocation2 + $0x8] sm:$0xff]  ;;  %v260_v9 = vld [vmem:[#allocation8 + $0x8] sm:$0xff]  ;;  %s322_s17 = sshll.u32 %s522_s3, 4  ;;  %s310_s19 = sshll.u32 %s523_s18, 4  ;;  %s323_s17 = int_to_ptr.vmem [resolvable:$true] %s322_s17  ;;  %s311_s19 = int_to_ptr.vmem [resolvable:$true] %s310_s19 }
  0x4e   :  { %349 = vmatprep.mubr.msk.f32.mxu1 %vm94_vm0, %v72_v5  ;;  %102 = vmatpush1.msra.mxu0 %v74_v4  ;;  %v259_v8 = vld [vmem:[#allocation8] sm:$0xff]  ;;  %v80_v12 = vshrl.u32 %v79_v11, 7  ;;  %v77_v15 = vld [vmem:[#allocation7] sm:$0x7]  ;;  %s458_s20 = scalar_lea.vmem %s323_s17, 768  ;;  %p463_p5 = scmp.lt.s32.totalorder %s323_s17, %s323_s17 }
  0x4f   :  { %347 = vmatprep.subr.mxu1 %v76_v6  ;;  %340 = vmatmul.mubr.msk.f32.vlgmr.msra.gmra.mrb[0].mxu0 %vm94_vm0, %v72_v5  ;;  %p459_p4 = scmp.ne.s32.totalorder %s323_s17, %s458_s20  ;;  %p464_p6 = scmp.lt.s32.totalorder %s458_s20, %s458_s20 }
  0x50   :  { %348 = vmatpush3.msra.mxu1 %v76_v6  ;;  %171 = vmatprep.mubr.f32.mxu0 %v518_v0  ;;  %v81_v14 = vsub.s32 0, %v80_v12  ;;  %v85_v16 = vsub.s32 1, %v80_v12  ;;  %v89_v18 = vsub.s32 2, %v80_v12 }
  0x51   :  { %350 = vmatmul.mubr.msk.f32.vlgmr.msra.gmra.mrb[0].mxu1 %vm94_vm0, %v73_v7  ;;  %278 = vperm.xlu1 %367, %v259_v8   ;;  %p465_p7 = por %p464_p6, %p463_p5 }
  0x52   :  { %265 = vperm.xlu0 %366, %v259_v8   ;;  %v82_v20 = vrot.slane %v77_v15, %v81_v14  ;;  %v86_v21 = vrot.slane %v77_v15, %v85_v16  ;;  %v90_v22 = vrot.slane %v77_v15, %v89_v18 }
  0x53   :  { %341 = vmatmul.mubr.msk.f32.gmra.mrb[2].mxu0 %vm94_vm0, %v73_v7  ;;  %p466_p8 = pnand %p465_p7, %p459_p4 }
  0x55   :  { %282 = vperm.xlu1 %367, %v260_v9  }
  0x56   :  { %270 = vperm.xlu0 %366, %v260_v9  }
  0x59   :  { %369 = vset.pattern.permute.xlu1 %v521_v10 }
  0x5a   :  { %368 = vset.pattern.permute.xlu0 %v521_v10  ;;  %296 = vperm.xlu1 %369, %v260_v9  }
  0x5b   :  { %292 = vperm.xlu0 %368, %v259_v8  }
  0xd0   :  { %v279_v17 = vpop.permute.xlu1 %278 }
  0xd1   :  { %v266_v13 = vpop.permute.xlu0 %265 }
  0xd4   :  { %v283_v24 = vpop.permute.xlu1 %282 }
  0xd5   :  { %v271_v19 = vpop.permute.xlu0 %270 }
  0xd9   :  { %v297_v39 = vpop.permute.xlu1 %296 }
  0xda   :  { %v293_v31 = vpop.permute.xlu0 %292 }
 0x122   :  { %v167_v23 = vpop.f32.mrb[0].mxu0 }
 0x123   :  { %v168_v25 = vadd.f32 %v167_v23, %v82_v20  ;;  %v169_v26 = vpop.f32.mrb[1].mxu0 }
 0x124   :  { %v351_v27 = vpop.f32.mrb[0].mxu1  ;;  %v170_v28 = vadd.f32 %v169_v26, %v86_v21 }
 0x125   :  { %v250_v29 = vadd.f32 %v351_v27, %v90_v22  ;;  %v244_v30 = vpop.f32.mrb[1].mxu1  ;;  %253 = vst [vmem:[#allocation11] sm:$0xff] %v168_v25  ;;  %v273_v33 = vmul.f32 %v266_v13, %v168_v25 }
 0x126   :  { %v245_v32 = vadd.f32 %v244_v30, %v90_v22  ;;  %254 = vst [vmem:[#allocation11 + $0x8] sm:$0xff] %v170_v28  ;;  %v285_v34 = vmul.f32 %v279_v17, %v170_v28  ;;  %v173_v35 = vpop.f32.mrb[2].mxu0 }
 0x127   :  { %258 = vst [vmem:[#allocation11 + $0x28] sm:$0xff] %v250_v29  ;;  %v174_v36 = vadd.f32 %v173_v35, %v82_v20  ;;  %v175_v37 = vpop.f32.mrb[3].mxu0  ;;  %v300_v45 = vmul.f32 %v297_v39, %v250_v29 }
 0x128   :  { %255 = vst [vmem:[#allocation11 + $0x10] sm:$0xff] %v245_v32  ;;  %v299_v38 = vmul.f32 %v293_v31, %v245_v32  ;;  %v287_v40 = vadd.f32 %v285_v34, %v273_v33  ;;  %v176_v41 = vadd.f32 %v175_v37, %v86_v21 }
 0x129   :  { %256 = vst [vmem:[#allocation11 + $0x18] sm:$0xff] %v174_v36  ;;  %v274_v42 = vmul.f32 %v271_v19, %v174_v36 }
 0x12a   :  { %257 = vst [vmem:[#allocation11 + $0x20] sm:$0xff] %v176_v41  ;;  %v286_v43 = vmul.f32 %v283_v24, %v176_v41  ;;  %v301_v44 = vadd.f32 %v299_v38, %v287_v40 }
 0x12b   :  { %469 = shalt.err (!%p466_p8)
}
 0x12c   :  { %s470_s24 = scalar_lea.hbm %s660_s5, 768 }
 0x12d   :  { %p471_p9 = scmp.ne.s32.totalorder %s660_s5, %s470_s24  ;;  %p474_p10 = scmp.lt.u32.totalorder %s470_s24, %s660_s5 }
 0x12f   :  { %p476_p11 = pnand %p474_p10, %p471_p9 }
 0x131   :  { %479 = shalt.err (!%p476_p11)
}
 0x132   :  { %s524_s29 = smov 384   ;;  %s525_s0 = smov 24   ;;  %v288_v46 = vadd.f32 %v286_v43, %v274_v42  ;;  %303 = vst [vmem:[#allocation10] sm:$0xff] %v301_v44 }
 0x133   :  { %328 = dma.vmem_to_hbm [thread:$0]  %s323_s17, 768, %s660_s5, [#allocation12], %s524_s29, %s524_s29, %s525_s0  }
 0x134   :  { %v302_v47 = vadd.f32 %v300_v45, %v288_v46  ;;  %s480_s6 = scalar_lea.vmem %s311_s19, 256  ;;  %p485_p13 = scmp.lt.s32.totalorder %s311_s19, %s311_s19 }
 0x135   :  { %p481_p12 = scmp.ne.s32.totalorder %s311_s19, %s480_s6  ;;  %p486_p0 = scmp.lt.s32.totalorder %s480_s6, %s480_s6 }
 0x136   :  { %304 = vst [vmem:[#allocation10 + $0x8] sm:$0xff] %v302_v47 }
 0x137   :  { %p487_p1 = por %p486_p0, %p485_p13 }
 0x139   :  { %p488_p2 = pnand %p487_p1, %p481_p12 }
 0x13b   :  { %491 = shalt.err (!%p488_p2)
}
 0x13c   :  { %s492_s9 = scalar_lea.hbm %s659_s4, 256 }
 0x13d   :  { %p493_p3 = scmp.ne.s32.totalorder %s659_s4, %s492_s9  ;;  %p496_p4 = scmp.lt.u32.totalorder %s492_s9, %s659_s4 }
 0x13f   :  { %p498_p5 = pnand %p496_p4, %p493_p3 }
 0x141   :  { %501 = shalt.err (!%p498_p5)
}
 0x142   :  { %316 = dma.vmem_to_hbm [thread:$0]  %s311_s19, 256, %s659_s4, [#allocation4], %s514_s1, %s514_s1, %s515_s15  }
 0x143   :  { %508 = dma.done.wait [#allocation4], 256  }
 0x144   :  { %509 = vsyncadd [#allocation4], 4294967040 }
 0x145   :  { %510 = dma.done.wait [#allocation12], 768  }
 0x146   :  { %511 = vsyncadd [#allocation12], 4294966528 }
 0x147   :  { %335 = vsyncpa [#allocation3], 1 }
 0x148   :  { %336 = vsyncpa [#allocation6], 1 }
 0x149   :  { %337 = vsyncpa [#allocation9], 1 }
 0x14a   :  { %338 = vsyncpa [#allocation4], 1 }
 0x14b   :  { %339 = vsyncpa [#allocation12], 1 }

</bundles_post_ra>
